<compile_context>
chip_gen: v5e
topology: v5e:2x2
jax: 0.10.0
libtpu: 0.0.40
codegen_flags: <defaults>
</compile_context>

<pallas_src>
import jax
import jax.numpy as jnp
from jax.experimental import pallas as pl
from jax.experimental.pallas import tpu as pltpu


def _rope_kernel(inv_freq_ref, pos_ref, cos_ref, sin_ref):
    """One row-tile grid step.

    inv_freq_ref : (1, half)   f32
    pos_ref      : (tR, 1)     f32   positions as a sublane column
    cos_ref/sin_ref : (tR, dim) out dtype, dim == 2 * half
    """
    pos = pos_ref[...]                      # (tR, 1)   f32
    inv = inv_freq_ref[...]                 # (1, half) f32
    # Outer product via broadcast: lane-broadcast of pos x sublane-broadcast of inv.
    freqs = pos * inv                       # (tR, half) f32
    # Transcendentals on the unique half only; emb = concat(freqs, freqs).
    c = jnp.cos(freqs).astype(cos_ref.dtype)
    s = jnp.sin(freqs).astype(sin_ref.dtype)
    # Single full-width (unmasked) store per output.
    cos_ref[...] = jnp.concatenate([c, c], axis=-1)
    sin_ref[...] = jnp.concatenate([s, s], axis=-1)


def _reference(x, position_ids, *, dim, base=10000.0):
    inv_freq = 1.0 / (base ** (jnp.arange(0, dim, 2, dtype=jnp.float32) / dim))
    freqs = position_ids.astype(jnp.float32)[:, :, None] * inv_freq[None, None, :]
    emb = jnp.concatenate([freqs, freqs], axis=-1)
    return jnp.cos(emb).astype(x.dtype), jnp.sin(emb).astype(x.dtype)


def _round_up(x, m):
    return ((x + m - 1) // m) * m


def moe_rotary_embedding(x, position_ids, *, dim, base=10000.0, scaling_factor=1.0,
                         min_pallas_elems=256 * 1024):
    """Equivalent of MoeRotaryEmbedding(dim, base=...).forward(x, position_ids).

    scaling_factor only affects the cached buffers built in __init__, not forward(),
    so it is accepted for signature parity but unused.
    """
    del scaling_factor  # not used by forward()
    assert dim % 2 == 0, "MoeRotaryEmbedding requires an even rotary dim"
    B, S = position_ids.shape
    half = dim // 2
    out_dtype = x.dtype
    itemsize = jnp.dtype(out_dtype).itemsize
    R = B * S

    # Tiny tables: fixed per-step DMA/launch overhead dominates; fused XLA is cheaper.
    if R * dim < min_pallas_elems:
        return _reference(x, position_ids, dim=dim, base=base)

    # inv_freq buffer (mirrors __init__), plain JAX glue.
    inv_freq = (1.0 / (base ** (jnp.arange(0, dim, 2, dtype=jnp.float32) / dim))
                ).reshape(1, half)

    # Positions as an (R, 1) f32 column (free reshape): in-kernel outer product is a
    # cheap broadcast multiply, no per-step lane->sublane transpose.
    pos_col = position_ids.astype(jnp.float32).reshape(R, 1)

    # --- Row-tile sizing -----------------------------------------------------
    # Target ~4 MiB of output (cos+sin combined) per grid step so HBM writeback,
    # not per-step overhead, dominates; then shrink until the per-step VMEM
    # footprint fits a budget that is safe on every generation (v7x: 64 MiB phys).
    def per_step_bytes(tr):
        out_b = 2 * 2 * tr * dim * itemsize           # 2 outputs x 2 pipeline bufs
        pos_b = 2 * tr * 128 * 4                      # (tr,1) f32 lane-padded to 128
        inv_b = 2 * 8 * _round_up(half, 128) * 4      # tiny
        interm = 3 * tr * half * 4 + 2 * tr * dim * itemsize  # freqs,c,s f32 + rows
        return out_b + pos_b + inv_b + interm

    target_out_bytes = 4 << 20
    vmem_budget = 24 << 20

    tR = max(8, (target_out_bytes // (2 * dim * itemsize)) // 8 * 8)
    while per_step_bytes(tR) > vmem_budget and tR > 8:
        tR = max(8, (tR // 2) // 8 * 8)
    if tR >= R:
        tR = R
        if R > 8:
            # >= 2 grid steps so both v7x TensorCores get work (megacore sharding).
            tR = _round_up(pl.cdiv(R, 2), 8)
    n_tiles = pl.cdiv(R, tR)

    vmem_limit = int(min(32 << 20, max(16 << 20, per_step_bytes(tR) + (4 << 20))))

    grid_spec = pltpu.PrefetchScalarGridSpec(
        num_scalar_prefetch=0,
        grid=(n_tiles,),
        in_specs=[
            pl.BlockSpec((1, half), lambda i: (0, 0)),   # inv_freq (shared)
            pl.BlockSpec((tR, 1), lambda i: (i, 0)),     # positions column
        ],
        out_specs=[
            pl.BlockSpec((tR, dim), lambda i: (i, 0)),   # cos rows
            pl.BlockSpec((tR, dim), lambda i: (i, 0)),   # sin rows
        ],
    )

    cos, sin = pl.pallas_call(
        _rope_kernel,
        out_shape=(
            jax.ShapeDtypeStruct((R, dim), out_dtype),
            jax.ShapeDtypeStruct((R, dim), out_dtype),
        ),
        grid_spec=grid_spec,
        compiler_params=pltpu.CompilerParams(
            dimension_semantics=("parallel",),
            vmem_limit_bytes=vmem_limit,
        ),
    )(inv_freq, pos_col)

    # Free row-major reshapes back to the caller-facing layout.
    return cos.reshape(B, S, dim), sin.reshape(B, S, dim)


if __name__ == "__main__":
    key = jax.random.PRNGKey(0)

    # Case 1: small demo shape consistent with the module
    # (batch=2, heads=4, seq=8, head_dim=32). x is only used for its dtype.
    B, S, H, dim = 2, 8, 4, 32
    kx, _ = jax.random.split(key)
    x = jax.random.normal(kx, (B, H, S, dim), dtype=jnp.float32)
    position_ids = jnp.tile(jnp.arange(S, dtype=jnp.int32)[None, :], (B, 1))

    # Force the Pallas path (default min_pallas_elems would route this tiny table
    # to the fused-XLA fallback).
    cos, sin = moe_rotary_embedding(x, position_ids, dim=dim, min_pallas_elems=0)
    cos, sin = jax.block_until_ready((cos, sin))

    cos_ref, sin_ref = _reference(x, position_ids, dim=dim)
    assert cos.shape == (B, S, dim) and sin.shape == (B, S, dim)
    assert cos.dtype == x.dtype and sin.dtype == x.dtype
    assert jnp.allclose(cos, cos_ref, atol=1e-5, rtol=1e-5)
    assert jnp.allclose(sin, sin_ref, atol=1e-5, rtol=1e-5)

    # Case 2: exercise the flattened row-tiled path with a lane-dense dim=128
    # output and a bf16 out dtype (R = 4096 rows -> 2 grid steps).
    B2, S2, dim2 = 2, 2048, 128
    x2 = jnp.zeros((B2, 1, S2, dim2), dtype=jnp.bfloat16)
    pos2 = jnp.tile(jnp.arange(S2, dtype=jnp.int32)[None, :], (B2, 1))
    cos2, sin2 = moe_rotary_embedding(x2, pos2, dim=dim2)
    cos2, sin2 = jax.block_until_ready((cos2, sin2))
    cos2_ref, sin2_ref = _reference(x2, pos2, dim=dim2)
    assert cos2.shape == (B2, S2, dim2) and sin2.shape == (B2, S2, dim2)
    assert cos2.dtype == jnp.bfloat16 and sin2.dtype == jnp.bfloat16
    assert jnp.allclose(cos2.astype(jnp.float32), cos2_ref.astype(jnp.float32),
                        atol=2e-2, rtol=2e-2)
    assert jnp.allclose(sin2.astype(jnp.float32), sin2_ref.astype(jnp.float32),
                        atol=2e-2, rtol=2e-2)

    print("KERNEL_OK")
</pallas_src>

<mosaic_0001>
module attributes {stable_mosaic.version = 11 : i64} {
  func.func @_rope_kernel(%arg0: i32, %arg1: memref<1x16xf32, #tpu.memory_space<vmem>>, %arg2: memref<8x1xf32, #tpu.memory_space<vmem>>, %arg3: memref<8x32xf32, #tpu.memory_space<vmem>>, %arg4: memref<8x32xf32, #tpu.memory_space<vmem>>) attributes {dimension_semantics = [#tpu.dimension_semantics<parallel>], iteration_bounds = array<i64: 2>, scalar_prefetch = 0 : i64, scratch_operands = 0 : i64, tpu.core_type = #tpu.core_type<tc>, window_params = [{pipeline_mode = #tpu.pipeline_mode<synchronous>, transform_indices = @transform_0, window_bounds = array<i64: 1, 16>}, {transform_indices = @transform_1, window_bounds = array<i64: 8, 1>}, {transform_indices = @transform_2, window_bounds = array<i64: 8, 32>}, {transform_indices = @transform_3, window_bounds = array<i64: 8, 32>}]} {
    %c0 = arith.constant 0 : index
    %c0_0 = arith.constant 0 : index
    %0 = vector.load %arg2[%c0, %c0_0] : memref<8x1xf32, #tpu.memory_space<vmem>>, vector<8x1xf32>
    %c0_1 = arith.constant 0 : index
    %c0_2 = arith.constant 0 : index
    %1 = vector.load %arg1[%c0_1, %c0_2] : memref<1x16xf32, #tpu.memory_space<vmem>>, vector<1x16xf32>
    %2 = vector.broadcast %0 : vector<8x1xf32> to vector<8x16xf32>
    %3 = vector.broadcast %1 : vector<1x16xf32> to vector<8x16xf32>
    %4 = arith.mulf %2, %3 : vector<8x16xf32>
    %5 = math.cos %4 : vector<8x16xf32>
    %6 = math.sin %4 : vector<8x16xf32>
    %7 = tpu.concatenate %5, %5 in 1 : vector<8x16xf32>, vector<8x16xf32> -> vector<8x32xf32>
    %c0_3 = arith.constant 0 : index
    %c0_4 = arith.constant 0 : index
    %8 = vector.load %arg3[%c0_3, %c0_4] : memref<8x32xf32, #tpu.memory_space<vmem>>, vector<8x32xf32>
    tpu.vector_store %arg3[%c0_3, %c0_4], %7 {strides = array<i32>} : memref<8x32xf32, #tpu.memory_space<vmem>>, vector<8x32xf32>,
    %9 = tpu.concatenate %6, %6 in 1 : vector<8x16xf32>, vector<8x16xf32> -> vector<8x32xf32>
    %c0_5 = arith.constant 0 : index
    %c0_6 = arith.constant 0 : index
    %10 = vector.load %arg4[%c0_5, %c0_6] : memref<8x32xf32, #tpu.memory_space<vmem>>, vector<8x32xf32>
    tpu.vector_store %arg4[%c0_5, %c0_6], %9 {strides = array<i32>} : memref<8x32xf32, #tpu.memory_space<vmem>>, vector<8x32xf32>,
    return
  }
  func.func @transform_0(%arg0: i32) -> (i32, i32) {
    %c0_i32 = arith.constant 0 : i32
    %c0_i32_0 = arith.constant 0 : i32
    %c0_i32_1 = arith.constant 0 : i32
    return %c0_i32, %c0_i32_0 : i32, i32
  }
  func.func @transform_1(%arg0: i32) -> (i32, i32) {
    %c0_i32 = arith.constant 0 : i32
    %c0_i32_0 = arith.constant 0 : i32
    return %arg0, %c0_i32 : i32, i32
  }
  func.func @transform_2(%arg0: i32) -> (i32, i32) {
    %c0_i32 = arith.constant 0 : i32
    %c0_i32_0 = arith.constant 0 : i32
    return %arg0, %c0_i32 : i32, i32
  }
  func.func @transform_3(%arg0: i32) -> (i32, i32) {
    %c0_i32 = arith.constant 0 : i32
    %c0_i32_0 = arith.constant 0 : i32
    return %arg0, %c0_i32 : i32, i32
  }
}

</mosaic_0001>

<bundles_post_ra>
// kernel: tpu_custom_call.1
= control target key start
LH: loop header
LB: loop body
LE: loop exit
PB: predicated region body
PF: predicated region fallthrough
CT: control target
= control target key end

     0   :  { %9 = vsyncpa [#allocation3], 0  ;;  %s1009_s0 = inlined_call_operand.vmem [shape: f32[1,16], index: 0, kind: input, shape index: {}]   ;;  %s1010_s1 = inlined_call_operand.vmem [shape: f32[16,1], index: 1, kind: input, shape index: {}]   ;;  %s1011_s2 = inlined_call_operand.hbm [shape: f32[16,32], index: 2, kind: output, shape index: {0}]   ;;  %s1012_s3 = inlined_call_operand.hbm [shape: f32[16,32], index: 3, kind: output, shape index: {1}]  }
   0x1   :  { %11 = vsyncpa [#allocation3 + $0x1], 0 }
   0x2   :  { %12 = vsyncpa [#allocation5], 0 }
   0x3   :  { %14 = vsyncpa [#allocation5 + $0x1], 0  ;;  %s835_s12 = smov 0   ;;  %s837_s13 = smov 0  }
   0x4   :  { %s839_s14 = smov 0   ;;  %s841_s15 = smov 0  }
   0x5 LB: > { %s856_s16 = sadd.s32 4294967295, %s805_s15   ;;  %s638_s17 = sadd.s32 4294967294, %s805_s15   ;;  %s805_s15 = sphi %s841_s15, %s1018_s15   ;;  %s801_s14 = sphi %s839_s14, %s1017_s14   ;;  %s797_s13 = sphi %s837_s13, %s1016_s13   ;;  %s793_s12 = sphi %s835_s12, %s1015_s12  }
   0x6   : > { %s860_s18 = sadd.s32 1, %s805_s15   ;;  %s74_s19 = sadd.s32 1, %s801_s14 }
   0x7   : > { %s71_s20 = ssub.s32 %s805_s15, %s860_s18  ;;  %p84_p0 = scmp.ne.s32.totalorder %s801_s14, %s797_s13 }
   0x8   : > { %p72_p1 = scmp.eq.s32.totalorder %s71_s20, 0  ;;  %p85_p2 = scmp.eq.s32.totalorder %s856_s16, 1 }
   0x9   : > { %p90_p3 = scmp.ne.s32.totalorder %s797_s13, %s793_s12  ;;  %p91_p4 = scmp.eq.s32.totalorder %s638_s17, 1 }
   0xa   : > { %s871_s21 = scalar_select %p72_p1, %s801_s14, %s74_s19  }
   0xb   : > { %p873_p5 = por %p85_p2, %p84_p0  ;;  %p877_p6 = por %p91_p4, %p90_p3 }
   0xc   : > { %p641_p7 = scmp.ge.s32.totalorder %s805_s15, 1  ;;  %p145_p8 = scmp.lt.s32.totalorder %s805_s15, 3 }
   0xe   : > { %p146_p9 = pnand %p641_p7, %p145_p8 }
   0xf   : > { %p173_p10 = scmp.lt.s32.totalorder (!%p146_p9), %s856_s16, 1  ;;  %s814_s4 = smov (!%p146_p9), 16  }
  0x10   : > { %149 = sbr.rel (%p146_p9) target bundleno = 370 (0x172), region = 28  ;;  %s951_s5 = sand.u32 (!%p146_p9), 1, %s797_s13  }
  0x11   : > { %s642_s6 = sshll.u32 (!%p146_p9), %s951_s5, 3  ;;  %s653_s7 = sshll.u32 (!%p146_p9), %s856_s16, 3 }
  0x12   : > { %s527_s10 = scalar_lea.hbm (!%p146_p9), %s1011_s2, %s653_s7  ;;  %s541_s19 = scalar_lea.hbm (!%p146_p9), %s1012_s3, %s653_s7 }
  0x13   : > { %s165_s20 = scalar_lea.vmem (!%p146_p9), [#allocation2], %s642_s6  ;;  %s172_s26 = scalar_lea.vmem (!%p146_p9), [#allocation4], %s642_s6 }
  0x14   : > { %s543_s27 = sshll.u32 (!%p146_p9), %s172_s26, 4  ;;  %s731_s7 = scalar_lea.hbm (!%p146_p9), %s1011_s2, 16  ;;  %s961_s27 = int_to_ptr.vmem [resolvable:$true] %s543_s27 }
  0x15   : > { %v807_v0 = vmov 0   ;;  %s174_s24 = scalar_select %p173_p10, %s856_s16, 1  ;;  %v710_v2 = vld [vmem:[%s1009_s0] ss:$0 sm:$0xff]  ;;  %v808_v16 = vmov 2102212464  }
  0x16   : > { %709 = vset.pattern.permute.xlu0 %v807_v0  ;;  %v809_v18 = vmov 920167782   ;;  %v810_v21 = vmov 1326507024   ;;  %v811_v23 = vmov 683565275  }
  0x17   : > { %s644_s25 = sshll.u32 %s174_s24, 3  ;;  %v812_v25 = vmov 2475754826   ;;  %v813_v28 = vmov 2131351028   ;;  %s529_s24 = sshll.u32 %s165_s20, 4  ;;  %s530_s24 = int_to_ptr.vmem [resolvable:$true] %s529_s24 }
  0x18   : > { %s176_s28 = scalar_lea.vmem %s1010_s1, %s644_s25  ;;  %s531_s25 = sshll.u32 %s527_s10, 4  ;;  %s532_s25 = int_to_ptr.hbm [resolvable:$true] %s531_s25 }
  0x19   : > { %v177_v1 = vld [vmem:[%s176_s28] sm:$0xff]  ;;  %s545_s28 = sshll.u32 %s541_s19, 4  ;;  %s512_s16 = scalar_lea.sflag [#allocation3], %s951_s5  ;;  %s963_s28 = int_to_ptr.hbm [resolvable:$true] %s545_s28 }
  0x1a   : > { %181 = vperm.xlu0 %709, %v177_v1   ;;  %s725_s29 = sshra.s32 %s532_s25, 4  ;;  %s726_s29 = int_to_ptr.hbm [resolvable:$true] %s725_s29 }
  0x1b   : > { %s727_s30 = scalar_lea.hbm %s726_s29, 8  ;;  %p732_p0 = scmp.lt.s32.totalorder %s726_s29, %s1011_s2 }
  0x1c   : > { %p728_p11 = scmp.ne.s32.totalorder %s726_s29, %s727_s30  ;;  %p733_p1 = scmp.lt.s32.totalorder %s731_s7, %s727_s30 }
  0x1e   : > { %p729_p12 = pnand %p728_p11, %p873_p5  ;;  %p734_p2 = por %p733_p1, %p732_p0 }
  0x20   : > { %p730_p13 = pneg %p729_p12 }
  0x22   : > { %p735_p3 = pnand %p734_p2, %p730_p13 }
  0x8c   : > { %v182_v3 = vpop.permute.xlu0 %181 }
  0x8d   : > { %v892_v4 = vmul.f32 %v710_v2, %v182_v3 }
  0x8f   : > { %v191_v5 = vand.u32 2139095040, %v892_v4  ;;  %v188_v8 = vand.u32 2147483647, %v892_v4  ;;  %vm190_vm12 = vcmp.lt.s32.totalorder %v892_v4, 0 }
  0x91   : > { %v192_v6 = vshrl.u32 %v191_v5, 23  ;;  %v195_v10 = vand.u32 8388607, %v188_v8  ;;  %vm189_vm13 = vcmp.le.f32.partialorder %v188_v8, 0.7853982 }
  0x93   : > { %v645_v7 = vadd.s32 4294967169, %v192_v6  ;;  %v196_v14 = vor.u32 8388608, %v195_v10 }
  0x95   : > { %v198_v9 = vadd.s32 1, %v645_v7  ;;  %v907_v35 = vshll.u32 %v196_v14, 8 }
  0x97   : > { %vm199_vm0 = vcmp.gt.s32.totalorder %v198_v9, 0  ;;  %v237_v45 = vand.u32 65535, %v907_v35  ;;  %v238_v47 = vshrl.u32 %v907_v35, 16 }
  0x98   : > { %v200_v11 = vsel %vm199_vm0, %v198_v9, 0 }
  0x99   : > { %v202_v12 = vand.u32 31, %v200_v11  ;;  %v900_v15 = vshrl.u32 %v200_v11, 5 }
  0x9b   : > { %v898_v13 = vsub.s32 32, %v202_v12  ;;  %v214_v17 = vshll.u32 %v808_v16, %v202_v12  ;;  %v217_v19 = vshll.u32 %v809_v18, %v202_v12  ;;  %v205_v24 = vshll.u32 %v811_v23, %v202_v12 }
  0x9c   : > { %v208_v27 = vshll.u32 %v812_v25, %v202_v12  ;;  %v211_v30 = vshll.u32 %v813_v28, %v202_v12  ;;  %vm223_vm1 = vcmp.lt.s32.totalorder %v900_v15, 4  ;;  %vm220_vm2 = vcmp.lt.s32.totalorder %v900_v15, 1 }
  0x9d   : > { %v215_v20 = vshrl.u32 %v809_v18, %v898_v13  ;;  %v218_v22 = vshrl.u32 %v810_v21, %v898_v13  ;;  %v206_v26 = vshrl.u32 %v812_v25, %v898_v13  ;;  %v209_v29 = vshrl.u32 %v813_v28, %v898_v13 }
  0x9e   : > { %v212_v31 = vshrl.u32 %v808_v16, %v898_v13  ;;  %vm222_vm3 = vcmp.lt.s32.totalorder %v900_v15, 3  ;;  %vm221_vm4 = vcmp.lt.s32.totalorder %v900_v15, 2  ;;  %v204_v9 = vshrl.u32 %v811_v23, %v898_v13 }
  0x9f   : > { %v216_v32 = vor.u32 %v215_v20, %v214_v17  ;;  %v219_v33 = vor.u32 %v218_v22, %v217_v19  ;;  %v207_v34 = vor.u32 %v206_v26, %v205_v24  ;;  %v210_v36 = vor.u32 %v209_v29, %v208_v27 }
  0xa0   : > { %v213_v37 = vor.u32 %v212_v31, %v211_v30 }
  0xa1   : > { %v229_v38 = vsel %vm223_vm1, %v216_v32, 920167782  ;;  %v233_v39 = vsel %vm223_vm1, %v219_v33, 1326507024  ;;  %v228_v40 = vsel %vm220_vm2, %v207_v34, %v210_v36  ;;  %v224_v17 = vsel %vm220_vm2, %v204_v9, %v207_v34 }
  0xa2   : > { %v230_v41 = vsel %vm222_vm3, %v213_v37, %v229_v38  ;;  %v232_v42 = vsel %vm220_vm2, %v210_v36, %v213_v37  ;;  %v234_v44 = vsel %vm222_vm3, %v216_v32, %v233_v39  ;;  %v225_v5 = vsel %vm223_vm1, %v213_v37, 2102212464 }
  0xa3   : > { %v231_v43 = vsel %vm221_vm4, %v228_v40, %v230_v41  ;;  %v235_v46 = vsel %vm221_vm4, %v232_v42, %v234_v44  ;;  %v226_v18 = vsel %vm222_vm3, %v210_v36, %v225_v5 }
  0xa4   : > { %v261_v48 = vand.u32 65535, %v231_v43  ;;  %v262_v49 = vshrl.u32 %v231_v43, 16  ;;  %v239_v50 = vand.u32 65535, %v235_v46  ;;  %v240_v51 = vshrl.u32 %v235_v46, 16 }
  0xa5   : > { %v227_v23 = vsel %vm221_vm4, %v224_v17, %v226_v18  ;;  %vm331_vm4 = vweird.f32 %v892_v4 }
  0xa6   : > { %v264_v52 = vmul.u32 %v262_v49, %v237_v45  ;;  %v265_v53 = vmul.u32 %v261_v48, %v238_v47  ;;  %v242_v54 = vmul.u32 %v240_v51, %v237_v45  ;;  %v243_v55 = vmul.u32 %v239_v50, %v238_v47 }
  0xa7   : > { %v263_v56 = vmul.u32 %v261_v48, %v237_v45  ;;  %v241_v58 = vmul.u32 %v239_v50, %v237_v45  ;;  %v266_v60 = vmul.u32 %v262_v49, %v238_v47  ;;  %v244_v61 = vmul.u32 %v240_v51, %v238_v47 }
  0xa8   : > { %v267_v57 = vshll.u32 %v264_v52, 16  ;;  %v245_v59 = vshll.u32 %v242_v54, 16  ;;  %v269_v62 = vshll.u32 %v265_v53, 16  ;;  %v247_v1 = vshll.u32 %v243_v55, 16 }
  0xa9   : > { %v268_v14 = vshrl.u32 %v264_v52, 16  ;;  %v246_v19 = vshrl.u32 %v242_v54, 16  ;;  %v270_v21 = vshrl.u32 %v265_v53, 16  ;;  %v248_v24 = vshrl.u32 %v243_v55, 16 }
  0xaa   : > { %vm271_vm5 = vc.u32 %v263_v56, %v267_v57  ;;  %v273_v63 = vadd.s32 %v267_v57, %v263_v56  ;;  %vm249_vm6 = vc.u32 %v241_v58, %v245_v59  ;;  %v251_v2 = vadd.s32 %v245_v59, %v241_v58 }
  0xab   : > { %v272_v3 = vsel %vm271_vm5, 1, %v807_v0  ;;  %v250_v6 = vsel %vm249_vm6, 1, %v807_v0  ;;  %v281_v28 = vmul.u32 %v907_v35, %v227_v23  ;;  %vm501_vm5 = vcmask 130048  }
  0xac   : > { %v274_v7 = vadd.s32 %v272_v3, %v266_v60  ;;  %vm275_vm7 = vc.u32 %v273_v63, %v269_v62  ;;  %v252_v10 = vadd.s32 %v250_v6, %v244_v61  ;;  %vm253_vm8 = vc.u32 %v251_v2, %v247_v1 }
  0xad   : > { %v276_v11 = vsel %vm275_vm7, 1, %v807_v0  ;;  %v254_v12 = vsel %vm253_vm8, 1, %v807_v0  ;;  %v277_v0 = vadd.s32 %v273_v63, %v269_v62  ;;  %vm503_vm6 = vcmask 261120  }
  0xae   : > { %v278_v16 = vadd.s32 %v276_v11, %v274_v7  ;;  %v256_v20 = vadd.s32 %v254_v12, %v252_v10 }
  0xb0   : > { %v279_v22 = vadd.s32 %v278_v16, %v268_v14  ;;  %v257_v13 = vadd.s32 %v256_v20, %v246_v19 }
  0xb2   : > { %v280_v25 = vadd.s32 %v279_v22, %v270_v21  ;;  %v258_v26 = vadd.s32 %v257_v13, %v248_v24 }
  0xb4   : > { %v284_v27 = vadd.s32 1, %v280_v25  ;;  %vm283_vm9 = vc.u32 %v258_v26, %v277_v0  ;;  %v282_v40 = vadd.s32 %v277_v0, %v258_v26 }
  0xb6   : > { %v285_v29 = vsel %vm283_vm9, %v284_v27, %v280_v25 }
  0xb7   : > { %v286_v30 = vadd.s32 %v285_v29, %v281_v28 }
  0xb9   : > { %v287_v31 = vadd.s32 536870912, %v286_v30 }
  0xbb   : > { %v288_v32 = vshrl.u32 %v287_v31, 30 }
  0xbd   : > { %v289_v33 = vshll.u32 %v288_v32, 30  ;;  %v312_v53 = vsub.s32 4, %v288_v32 }
  0xbf   : > { %v290_v34 = vsub.s32 %v286_v30, %v289_v33  ;;  %v313_v58 = vsel %vm190_vm12, %v312_v53, %v288_v32 }
  0xc0   : > { %v315_v61 = vsel %vm189_vm13, 0, %v313_v58 }
  0xc1   : > { %vm291_vm10 = vcmp.lt.s32.totalorder %v290_v34, 0  ;;  %v292_v36 = vsub.s32 0, %v290_v34  ;;  %v486_v3 = vadd.s32 3, %v315_v61  ;;  %v332_v9 = vand.u32 3, %v315_v61 }
  0xc3   : > { %v293_v37 = vsel %vm291_vm10, %v292_v36, %v290_v34  ;;  %v487_v10 = vand.u32 3, %v486_v3  ;;  %vm333_vm14 = vcmp.lt.s32.totalorder %v332_v9, 2  ;;  %vm334_vm15 = vcmp.eq.s32.totalorder %v332_v9, 0 }
  0xc4   : > { %v294_v38 = vclz %v293_v37  ;;  %vm337_vm3 = vcmp.eq.s32.totalorder %v332_v9, 2 }
  0xc5   : > { %vm488_vm0 = vcmp.lt.s32.totalorder %v487_v10, 2  ;;  %vm489_vm1 = vcmp.eq.s32.totalorder %v487_v10, 0  ;;  %vm492_vm2 = vcmp.eq.s32.totalorder %v487_v10, 2 }
  0xc6   : > { %v646_v39 = vadd.s32 4294967294, %v294_v38 }
  0xc8   : > { %vm647_vm11 = vcmp.lt.s32.totalorder %v646_v39, 0 }
  0xc9   : > { %v297_v15 = vsel %vm647_vm11, 0, %v646_v39 }
  0xca   : > { %v298_v41 = vsub.s32 32, %v297_v15  ;;  %v302_v42 = vsub.s32 4294967266, %v297_v15  ;;  %v299_v43 = vshll.u32 %v290_v34, %v297_v15 }
  0xcc   : > { %v300_v44 = vshrl.u32 %v282_v40, %v298_v41  ;;  %v303_v35 = vadd.s32 127, %v302_v42 }
  0xce   : > { %v301_v45 = vor.u32 %v300_v44, %v299_v43  ;;  %v304_v46 = vshll.u32 %v303_v35, 23 }
  0xd0   : > { %v305_v47 = vor.u32 4788187, %v304_v46  ;;  %v308_v49 = vcvt.s32.f32 %v301_v45 }
  0xd2   : > { %v306_v48 = vand.u32 2147483647, %v305_v47 }
  0xd4   : > { %v309_v50 = vmul.f32 %v308_v49, %v306_v48 }
  0xd6   : > { %v310_v51 = vxor.u32 2147483648, %v309_v50 }
  0xd8   : > { %v311_v52 = vsel %vm190_vm12, %v310_v51, %v309_v50 }
  0xd9   : > { %v314_v54 = vsel %vm189_vm13, %v892_v4, %v311_v52 }
  0xda   : > { %v316_v55 = vmul.f32 %v314_v54, %v314_v54 }
  0xdc   : > { %v317_v56 = vmul.f32 -0.001358992, %v316_v55  ;;  %v324_v57 = vmul.f32 -0.00019511016, %v316_v55 }
  0xde   : > { %v318_v59 = vadd.f32 0.041655596, %v317_v56  ;;  %v325_v60 = vadd.f32 0.008332121, %v324_v57 }
  0xe0   : > { %v319_v62 = vmul.f32 %v318_v59, %v316_v55  ;;  %v326_v63 = vmul.f32 %v325_v60, %v316_v55 }
  0xe2   : > { %v320_v1 = vadd.f32 -0.4999988, %v319_v62  ;;  %v327_v2 = vadd.f32 -0.16666654, %v326_v63 }
  0xe4   : > { %v321_v5 = vmul.f32 %v320_v1, %v316_v55  ;;  %v328_v6 = vmul.f32 %v327_v2, %v316_v55 }
  0xe6   : > { %v322_v7 = vadd.f32 1.0, %v321_v5  ;;  %v329_v8 = vadd.f32 1.0, %v328_v6 }
  0xe8   : > { %v330_v11 = vmul.f32 %v329_v8, %v314_v54  ;;  %v338_v12 = vxor.u32 2147483648, %v322_v7 }
  0xea   : > { %v335_v14 = vxor.u32 2147483648, %v330_v11  ;;  %v494_v17 = vsel %vm492_vm2, %v338_v12, %v330_v11  ;;  %v339_v19 = vsel %vm337_vm3, %v338_v12, %v330_v11 }
  0xec   : > { %v491_v16 = vsel %vm489_vm1, %v322_v7, %v335_v14  ;;  %v336_v18 = vsel %vm334_vm15, %v322_v7, %v335_v14 }
  0xed   : > { %v495_v20 = vsel %vm488_vm0, %v491_v16, %v494_v17  ;;  %v340_v21 = vsel %vm333_vm14, %v336_v18, %v339_v19 }
  0xee   : > { %v496_v22 = vsel %vm331_vm4, nan, %v495_v20  ;;  %v341_v24 = vsel %vm331_vm4, nan, %v340_v21 }
  0xef   : > { %506 = vrot.lane.b32.xlu1 %v496_v22, %s814_s4  ;;  %498 = vrot.lane.b32.xlu0 %v341_v24, %s814_s4 }
 0x161   : > { %v507_v4 = vpop.permute.xlu1 %506  ;;  %v499_v13 = vpop.permute.xlu0 %498 }
 0x162   : > { %v509_v23 = vsel %vm501_vm5, %v496_v22, %v507_v4  ;;  %v502_v25 = vsel %vm501_vm5, %v341_v24, %v499_v13 }
 0x163   : > { %504 = vst.msk [vmem:[%s165_s20] sm:$0xff] %vm503_vm6, %v502_v25 }
 0x164   : > { %738 = shalt.err (!%p735_p3)
}
 0x165   : > { %657 = dma.vmem_to_hbm [thread:$0]  (%p873_p5), %s530_s24, 128, %s532_s25, %s512_s16   ;;  %510 = vst.msk [vmem:[%s172_s26] sm:$0xff] %vm503_vm6, %v509_v23 }
 0x166   : > { %s517_s10 = scalar_lea.sflag [#allocation5], %s951_s5  ;;  %s753_s11 = sshra.s32 %s963_s28, 4  ;;  %s754_s11 = int_to_ptr.hbm [resolvable:$true] %s753_s11 }
 0x167   : > { %s755_s17 = scalar_lea.hbm %s754_s11, 8  ;;  %s759_s29 = scalar_lea.hbm %s1012_s3, 16 }
 0x168   : > { %p756_p4 = scmp.ne.s32.totalorder %s754_s11, %s755_s17  ;;  %p760_p9 = scmp.lt.s32.totalorder %s754_s11, %s1012_s3 }
 0x169   : > { %p761_p10 = scmp.lt.s32.totalorder %s759_s29, %s755_s17 }
 0x16a   : > { %p757_p7 = pnand %p756_p4, %p873_p5 }
 0x16b   : > { %p762_p11 = por %p761_p10, %p760_p9 }
 0x16c   : > { %p758_p8 = pneg %p757_p7 }
 0x16e   : > { %p763_p12 = pnand %p762_p11, %p758_p8 }
 0x170   : > { %766 = shalt.err (!%p763_p12)
}
 0x171   : > { %658 = dma.vmem_to_hbm [thread:$0]  (%p873_p5), %s961_s27, 128, %s963_s28, %s517_s10  }
 0x172 PF: > { %p668_p13 = scmp.ge.s32.totalorder %s805_s15, 2  ;;  %s557_s5 = sand.u32 1, %s793_s12  }
 0x173   : > { %s558_s24 = scalar_lea.sflag [#allocation3], %s557_s5 }
 0x174   : > { %p662_p0 = pnand %p668_p13, %p877_p6 }
 0x176   : > { %p663_p1 = pneg %p662_p0 }
 0x178   : > { %784 = dma.done.wait (%p663_p1), %s558_s24, 128  }
 0x179   : > { %786 = vsyncadd (%p663_p1), %s558_s24, 4294967168  ;;  %s568_s25 = scalar_lea.sflag [#allocation5], %s557_s5 }
 0x17a   : > { %788 = dma.done.wait (%p663_p1), %s568_s25, 128  }
 0x17b   : > { %790 = vsyncadd (%p663_p1), %s568_s25, 4294967168  ;;  %p17_p5 = scmp.ge.s32.totalorder %s860_s18, 4   ;;  %s1015_s12 = smov %s797_s13 }
 0x17c   : > { %s1016_s13 = smov %s801_s14  ;;  %s1017_s14 = smov %s871_s21 }
 0x17d   : > { %s1018_s15 = smov %s860_s18  ;;  %19 = sbr.rel (!%p17_p5) target bundleno = 5 (0x5), region = 80 }
 0x182   :  { %574 = vsyncpa [#allocation3], 1 }
 0x183   :  { %576 = vsyncpa [#allocation3 + $0x1], 1 }
 0x184   :  { %577 = vsyncpa [#allocation5], 1 }
 0x185   :  { %579 = vsyncpa [#allocation5 + $0x1], 1 }

</bundles_post_ra>
